<compile_context>
chip_gen: v7x
topology: tpu7x:2x2x1
jax: 0.10.0
libtpu: 0.0.40
codegen_flags: <defaults>
</compile_context>

<pallas_src>
import functools

import jax
import jax.numpy as jnp
from jax.experimental import pallas as pl
from jax.experimental.pallas import tpu as pltpu

P = 128  # padded hidden width (one full lane register); requires neuron_num <= 128


def _pinn_kernel(x_ref, w0_ref, b0_ref, wm_ref, bm_ref, wl_ref, bl_ref, o_ref,
                 *, num_mid):
    # x_ref:  (tile_g, 2G)      w0_ref: (2G, P)   b0_ref: (1, P)
    # wm_ref: (nm, P, P)        bm_ref: (nm, 1, P)
    # wl_ref: (P, G)            bl_ref: (1, 1)    o_ref:  (tile_g, G)
    w0 = w0_ref[...]

    # Layer 0 (G copies of 2 -> H, block-diagonal) on the MXU.
    lhs0 = x_ref[...].astype(w0.dtype)
    tmp = jnp.tanh(
        jnp.dot(lhs0, w0, preferred_element_type=jnp.float32) + b0_ref[...]
    )

    # Hidden layers (G copies of H -> H, block-diagonal), statically unrolled.
    for i in range(num_mid):
        w = wm_ref[i]
        tmp = jnp.tanh(
            jnp.dot(tmp.astype(w.dtype), w, preferred_element_type=jnp.float32)
            + bm_ref[i]
        )

    # Final layer (G copies of H -> 1): one real output column per group.
    wl = wl_ref[...]
    z = jnp.dot(tmp.astype(wl.dtype), wl, preferred_element_type=jnp.float32) \
        + bl_ref[...]
    o_ref[...] = jnp.tanh(z)


def pack_pinn_params(weights, biases, *, mxu_dtype=jnp.float32):
    """Pad/pack parameters once (hoisted out of the per-call path).

    weights[i]: (d_in, d_out), biases[i]: (d_out,). Layer 0 is (2,H), last is
    (H,1). G = 128 // H independent batch points are packed along lanes via
    block-diagonal weights. Padded rows/cols/biases are zero so padded lanes
    stay exactly 0 through tanh (tanh(0)=0) and never leak into real lanes.
    """
    L = len(weights)
    assert L >= 2
    H = weights[0].shape[1]
    assert 1 <= H <= P, "neuron_num must be <= 128 for this kernel"
    G = max(1, P // H)          # batch points packed per lane register
    num_mid = L - 2
    nm = max(1, num_mid)        # keep a dummy slot when there are no hidden layers

    w0 = jnp.zeros((2 * G, P), jnp.float32)
    b0 = jnp.zeros((1, P), jnp.float32)
    for g in range(G):
        w0 = w0.at[2 * g:2 * g + 2, g * H:(g + 1) * H].set(
            weights[0].astype(jnp.float32))
        b0 = b0.at[0, g * H:(g + 1) * H].set(biases[0].astype(jnp.float32))

    wm = jnp.zeros((nm, P, P), jnp.float32)
    bm = jnp.zeros((nm, 1, P), jnp.float32)
    for i in range(num_mid):
        w, b = weights[1 + i], biases[1 + i]
        for g in range(G):
            wm = wm.at[i, g * H:(g + 1) * H, g * H:(g + 1) * H].set(
                w.astype(jnp.float32))
            bm = bm.at[i, 0, g * H:(g + 1) * H].set(b.astype(jnp.float32))

    wl = jnp.zeros((P, G), jnp.float32)
    for g in range(G):
        wl = wl.at[g * H:(g + 1) * H, g].set(weights[-1][:, 0].astype(jnp.float32))
    bl = jnp.asarray(biases[-1], jnp.float32).reshape(1, 1)

    # Cast weights to the MXU dtype ONCE here (not per grid step in-kernel).
    # Biases stay f32: they are added to the f32 accumulator.
    return dict(w0=w0.astype(mxu_dtype), b0=b0,
                wm=wm.astype(mxu_dtype), bm=bm,
                wl=wl.astype(mxu_dtype), bl=bl,
                num_mid=num_mid, G=G, H=H)


def pinn_forward(x, packed, *, tile_m=256):
    """x: (N, 2) float32 collocation points. packed: output of pack_pinn_params."""
    N, d_in = x.shape
    assert d_in == 2
    G = packed["G"]
    num_mid = packed["num_mid"]
    nm = packed["wm"].shape[0]
    assert N % G == 0, "N must be a multiple of the lane-pack factor G = 128 // H"
    rows = N // G

    tile_g = max(8, min(tile_m // G, rows))   # packed rows per grid step
    assert rows % tile_g == 0 and tile_g % 8 == 0, \
        "N must tile evenly; no ragged-tail handling in this kernel"
    grid = (rows // tile_g,)

    # Row-major (N,2) -> (N/G, 2G) is a free reshape: packed row r holds
    # points r*G .. r*G+G-1, point g's (x,t) at columns [2g, 2g+1].
    x_packed = x.astype(jnp.float32).reshape(rows, 2 * G)

    kernel = functools.partial(_pinn_kernel, num_mid=num_mid)

    out = pl.pallas_call(
        kernel,
        out_shape=jax.ShapeDtypeStruct((rows, G), jnp.float32),
        grid_spec=pltpu.PrefetchScalarGridSpec(
            num_scalar_prefetch=0,
            grid=grid,
            in_specs=[
                pl.BlockSpec((tile_g, 2 * G), lambda i: (i, 0)),    # activations tile
                pl.BlockSpec((2 * G, P), lambda i: (0, 0)),         # layer-0 weight (resident)
                pl.BlockSpec((1, P), lambda i: (0, 0)),             # layer-0 bias
                # NOTE: for very deep nets on v5e, add pipeline_mode=pl.Buffered(1)
                # on these constant-index weight specs (or raise vmem_limit_bytes);
                # irrelevant at nm ~ a few layers.
                pl.BlockSpec((nm, P, P), lambda i: (0, 0, 0)),      # hidden weights (resident)
                pl.BlockSpec((nm, 1, P), lambda i: (0, 0, 0)),      # hidden biases
                pl.BlockSpec((P, G), lambda i: (0, 0)),             # last weight (G real cols)
                pl.BlockSpec((1, 1), lambda i: (0, 0)),             # last bias
            ],
            out_specs=pl.BlockSpec((tile_g, G), lambda i: (i, 0)),
        ),
        compiler_params=pltpu.CompilerParams(dimension_semantics=("parallel",)),
    )(x_packed, packed["w0"], packed["b0"], packed["wm"], packed["bm"],
      packed["wl"], packed["bl"])

    # (rows, G) row-major -> (N, 1): element (r, g) is point r*G + g.
    return out.reshape(N, 1)


def init_pinn_params(key, neuron_num, layer_num):
    """Deterministic PyTorch-Linear-style init; weights stored as (in, out)."""
    dims = []
    for i in range(layer_num):
        if i == 0:
            dims.append((2, neuron_num))
        elif i == layer_num - 1:
            dims.append((neuron_num, 1))
        else:
            dims.append((neuron_num, neuron_num))
    weights, biases = [], []
    for (d_in, d_out) in dims:
        key, kw, kb = jax.random.split(key, 3)
        bound = 1.0 / jnp.sqrt(d_in)
        weights.append(jax.random.uniform(kw, (d_in, d_out), jnp.float32, -bound, bound))
        biases.append(jax.random.uniform(kb, (d_out,), jnp.float32, -bound, bound))
    return weights, biases


def pinn_forward_ref(x, weights, biases):
    tmp = x.astype(jnp.float32)
    for w, b in zip(weights, biases):
        tmp = jnp.tanh(tmp @ w + b)
    return tmp


if __name__ == "__main__":
    neuron_num, layer_num = 32, 4
    N = 512  # batch of (x, t) collocation points

    key = jax.random.PRNGKey(0)
    key, kx = jax.random.split(key)
    x = jax.random.uniform(kx, (N, 2), jnp.float32, -1.0, 1.0)

    weights, biases = init_pinn_params(key, neuron_num, layer_num)
    packed = pack_pinn_params(weights, biases)   # pack once, reuse across calls

    out = pinn_forward(x, packed, tile_m=256)    # G=4 lane packing, grid=(2,)
    out = jax.block_until_ready(out)

    ref = pinn_forward_ref(x, weights, biases)
    assert out.shape == (N, 1), out.shape
    assert jnp.allclose(out, ref, atol=1e-5, rtol=1e-5), float(jnp.abs(out - ref).max())

    print("KERNEL_OK")
</pallas_src>

<mosaic_0001>
module attributes {stable_mosaic.version = 11 : i64} {
  func.func @_pinn_kernel(%arg0: i32, %arg1: memref<64x8xf32, #tpu.memory_space<vmem>>, %arg2: memref<8x128xf32, #tpu.memory_space<vmem>>, %arg3: memref<1x128xf32, #tpu.memory_space<vmem>>, %arg4: memref<2x128x128xf32, #tpu.memory_space<vmem>>, %arg5: memref<2x1x128xf32, #tpu.memory_space<vmem>>, %arg6: memref<128x4xf32, #tpu.memory_space<vmem>>, %arg7: memref<1x1xf32, #tpu.memory_space<vmem>>, %arg8: memref<64x4xf32, #tpu.memory_space<vmem>>) attributes {dimension_semantics = [#tpu.dimension_semantics<parallel>], iteration_bounds = array<i64: 2>, scalar_prefetch = 0 : i64, scratch_operands = 0 : i64, tpu.core_type = #tpu.core_type<tc>, window_params = [{transform_indices = @transform_0, window_bounds = array<i64: 64, 8>}, {pipeline_mode = #tpu.pipeline_mode<synchronous>, transform_indices = @transform_1, window_bounds = array<i64: 8, 128>}, {pipeline_mode = #tpu.pipeline_mode<synchronous>, transform_indices = @transform_2, window_bounds = array<i64: 1, 128>}, {pipeline_mode = #tpu.pipeline_mode<synchronous>, transform_indices = @transform_3, window_bounds = array<i64: 2, 128, 128>}, {pipeline_mode = #tpu.pipeline_mode<synchronous>, transform_indices = @transform_4, window_bounds = array<i64: 2, 1, 128>}, {pipeline_mode = #tpu.pipeline_mode<synchronous>, transform_indices = @transform_5, window_bounds = array<i64: 128, 4>}, {pipeline_mode = #tpu.pipeline_mode<synchronous>, transform_indices = @transform_6, window_bounds = array<i64: 1, 1>}, {transform_indices = @transform_7, window_bounds = array<i64: 64, 4>}]} {
    %c0 = arith.constant 0 : index
    %c0_0 = arith.constant 0 : index
    %0 = vector.load %arg2[%c0, %c0_0] : memref<8x128xf32, #tpu.memory_space<vmem>>, vector<8x128xf32>
    %c0_1 = arith.constant 0 : index
    %c0_2 = arith.constant 0 : index
    %1 = vector.load %arg1[%c0_1, %c0_2] : memref<64x8xf32, #tpu.memory_space<vmem>>, vector<64x8xf32>
    %cst = arith.constant dense<0.000000e+00> : vector<64x128xf32>
    %2 = tpu.matmul %1, %0, %cst {dimension_numbers = #tpu.dot_dimension_numbers<[1], [0], [0], [1], [0, 0, 1, 1], [], []>} : vector<64x8xf32>, vector<8x128xf32>, vector<64x128xf32> -> vector<64x128xf32>
    %c0_3 = arith.constant 0 : index
    %c0_4 = arith.constant 0 : index
    %3 = vector.load %arg3[%c0_3, %c0_4] : memref<1x128xf32, #tpu.memory_space<vmem>>, vector<1x128xf32>
    %4 = vector.broadcast %3 : vector<1x128xf32> to vector<64x128xf32>
    %5 = arith.addf %2, %4 : vector<64x128xf32>
    %6 = math.tanh %5 : vector<64x128xf32>
    %c0_5 = arith.constant 0 : index
    %c0_6 = arith.constant 0 : index
    %c0_7 = arith.constant 0 : index
    %7 = vector.load %arg4[%c0_5, %c0_6, %c0_7] : memref<2x128x128xf32, #tpu.memory_space<vmem>>, vector<1x128x128xf32>
    %8 = vector.shape_cast %7 : vector<1x128x128xf32> to vector<128x128xf32>
    %cst_8 = arith.constant dense<0.000000e+00> : vector<64x128xf32>
    %9 = tpu.matmul %6, %8, %cst_8 {dimension_numbers = #tpu.dot_dimension_numbers<[1], [0], [0], [1], [0, 0, 1, 1], [], []>} : vector<64x128xf32>, vector<128x128xf32>, vector<64x128xf32> -> vector<64x128xf32>
    %c0_9 = arith.constant 0 : index
    %c0_10 = arith.constant 0 : index
    %c0_11 = arith.constant 0 : index
    %10 = vector.load %arg5[%c0_9, %c0_10, %c0_11] : memref<2x1x128xf32, #tpu.memory_space<vmem>>, vector<1x1x128xf32>
    %11 = vector.shape_cast %10 : vector<1x1x128xf32> to vector<1x128xf32>
    %12 = vector.broadcast %11 : vector<1x128xf32> to vector<64x128xf32>
    %13 = arith.addf %9, %12 : vector<64x128xf32>
    %14 = math.tanh %13 : vector<64x128xf32>
    %c1 = arith.constant 1 : index
    %c0_12 = arith.constant 0 : index
    %c0_13 = arith.constant 0 : index
    %15 = vector.load %arg4[%c1, %c0_12, %c0_13] : memref<2x128x128xf32, #tpu.memory_space<vmem>>, vector<1x128x128xf32>
    %16 = vector.shape_cast %15 : vector<1x128x128xf32> to vector<128x128xf32>
    %cst_14 = arith.constant dense<0.000000e+00> : vector<64x128xf32>
    %17 = tpu.matmul %14, %16, %cst_14 {dimension_numbers = #tpu.dot_dimension_numbers<[1], [0], [0], [1], [0, 0, 1, 1], [], []>} : vector<64x128xf32>, vector<128x128xf32>, vector<64x128xf32> -> vector<64x128xf32>
    %c1_15 = arith.constant 1 : index
    %c0_16 = arith.constant 0 : index
    %c0_17 = arith.constant 0 : index
    %18 = vector.load %arg5[%c1_15, %c0_16, %c0_17] : memref<2x1x128xf32, #tpu.memory_space<vmem>>, vector<1x1x128xf32>
    %19 = vector.shape_cast %18 : vector<1x1x128xf32> to vector<1x128xf32>
    %20 = vector.broadcast %19 : vector<1x128xf32> to vector<64x128xf32>
    %21 = arith.addf %17, %20 : vector<64x128xf32>
    %22 = math.tanh %21 : vector<64x128xf32>
    %c0_18 = arith.constant 0 : index
    %c0_19 = arith.constant 0 : index
    %23 = vector.load %arg6[%c0_18, %c0_19] : memref<128x4xf32, #tpu.memory_space<vmem>>, vector<128x4xf32>
    %cst_20 = arith.constant dense<0.000000e+00> : vector<64x4xf32>
    %24 = tpu.matmul %22, %23, %cst_20 {dimension_numbers = #tpu.dot_dimension_numbers<[1], [0], [0], [1], [0, 0, 1, 1], [], []>} : vector<64x128xf32>, vector<128x4xf32>, vector<64x4xf32> -> vector<64x4xf32>
    %c0_21 = arith.constant 0 : index
    %c0_22 = arith.constant 0 : index
    %25 = vector.load %arg7[%c0_21, %c0_22] : memref<1x1xf32, #tpu.memory_space<vmem>>, vector<1x1xf32>
    %26 = vector.broadcast %25 : vector<1x1xf32> to vector<64x4xf32>
    %27 = arith.addf %24, %26 : vector<64x4xf32>
    %28 = math.tanh %27 : vector<64x4xf32>
    %c0_23 = arith.constant 0 : index
    %c0_24 = arith.constant 0 : index
    %29 = vector.load %arg8[%c0_23, %c0_24] : memref<64x4xf32, #tpu.memory_space<vmem>>, vector<64x4xf32>
    tpu.vector_store %arg8[%c0_23, %c0_24], %28 {strides = array<i32>} : memref<64x4xf32, #tpu.memory_space<vmem>>, vector<64x4xf32>,
    return
  }
  func.func @transform_0(%arg0: i32) -> (i32, i32) {
    %c0_i32 = arith.constant 0 : i32
    %c0_i32_0 = arith.constant 0 : i32
    return %arg0, %c0_i32 : i32, i32
  }
  func.func @transform_1(%arg0: i32) -> (i32, i32) {
    %c0_i32 = arith.constant 0 : i32
    %c0_i32_0 = arith.constant 0 : i32
    %c0_i32_1 = arith.constant 0 : i32
    return %c0_i32, %c0_i32_0 : i32, i32
  }
  func.func @transform_2(%arg0: i32) -> (i32, i32) {
    %c0_i32 = arith.constant 0 : i32
    %c0_i32_0 = arith.constant 0 : i32
    %c0_i32_1 = arith.constant 0 : i32
    return %c0_i32, %c0_i32_0 : i32, i32
  }
  func.func @transform_3(%arg0: i32) -> (i32, i32, i32) {
    %c0_i32 = arith.constant 0 : i32
    %c0_i32_0 = arith.constant 0 : i32
    %c0_i32_1 = arith.constant 0 : i32
    %c0_i32_2 = arith.constant 0 : i32
    return %c0_i32, %c0_i32_0, %c0_i32_1 : i32, i32, i32
  }
  func.func @transform_4(%arg0: i32) -> (i32, i32, i32) {
    %c0_i32 = arith.constant 0 : i32
    %c0_i32_0 = arith.constant 0 : i32
    %c0_i32_1 = arith.constant 0 : i32
    %c0_i32_2 = arith.constant 0 : i32
    return %c0_i32, %c0_i32_0, %c0_i32_1 : i32, i32, i32
  }
  func.func @transform_5(%arg0: i32) -> (i32, i32) {
    %c0_i32 = arith.constant 0 : i32
    %c0_i32_0 = arith.constant 0 : i32
    %c0_i32_1 = arith.constant 0 : i32
    return %c0_i32, %c0_i32_0 : i32, i32
  }
  func.func @transform_6(%arg0: i32) -> (i32, i32) {
    %c0_i32 = arith.constant 0 : i32
    %c0_i32_0 = arith.constant 0 : i32
    %c0_i32_1 = arith.constant 0 : i32
    return %c0_i32, %c0_i32_0 : i32, i32
  }
  func.func @transform_7(%arg0: i32) -> (i32, i32) {
    %c0_i32 = arith.constant 0 : i32
    %c0_i32_0 = arith.constant 0 : i32
    return %arg0, %c0_i32 : i32, i32
  }
}

</mosaic_0001>

<bundles_post_ra>
// kernel: tpu_custom_call.1
= control target key start
LH: loop header
LB: loop body
LE: loop exit
PB: predicated region body
PF: predicated region fallthrough
CT: control target
= control target key end

     0   :  { %s1421_s26 = smov 0   ;;  %s1617_s0 = inlined_call_operand.vmem [shape: f32[128,8], index: 0, kind: input, shape index: {}]   ;;  %s1618_s1 = inlined_call_operand.vmem [shape: f32[8,128], index: 1, kind: input, shape index: {}]   ;;  %s1619_s2 = inlined_call_operand.vmem [shape: f32[1,128], index: 2, kind: input, shape index: {}]   ;;  %s1620_s3 = inlined_call_operand.vmem [shape: f32[2,128,128], index: 3, kind: input, shape index: {}]   ;;  %s1621_s4 = inlined_call_operand.vmem [shape: f32[2,1,128], index: 4, kind: input, shape index: {}]   ;;  %s1622_s5 = inlined_call_operand.vmem [shape: f32[128,4], index: 5, kind: input, shape index: {}]   ;;  %s1623_s6 = inlined_call_operand.<no memory space> [shape: f32[1,1], index: 6, kind: input, shape index: {}]   ;;  %s1624_s7 = inlined_call_operand.vmem [shape: f32[128,4], index: 7, kind: output, shape index: {}]  }
   0x1   :  { %v12_v0 = vstv %s1623_s6 }
   0x2   :  { %13 = vst [vmem:[#allocation2] sm:$0x1] %v12_v0 }
   0x3 LB: > { %s916_s27 = sadd.s32 4294967295, %s1375_s26   ;;  %p920_p0 = scmp.ge.s32.totalorder %s1375_s26, 1  ;;  %s1375_s26 = sphi %s1421_s26, %s19_s26  }
   0x4   : > { %p240_p1 = scmp.lt.s32.totalorder %s1375_s26, 3 }
   0x6   : > { %p241_p2 = pnand %p920_p0, %p240_p1 }
   0x7   : > { %v284_v1 = vld [vmem:[%s1618_s1] sm:$0xff] (!%p241_p2)  ;;  %s921_s6 = sshll.u32 (!%p241_p2), %s916_s27, 3  ;;  %v439_v3 = vld [vmem:[%s1620_s3 + $0x8] sm:$0xff] (!%p241_p2)  ;;  %v440_v5 = vld [vmem:[%s1620_s3 + $0x10] sm:$0xff] (!%p241_p2)  ;;  %vm300_vm0 = vcmask (!%p241_p2), 64512   ;;  %vm851_vm1 = vcmask (!%p241_p2), 31744  }
   0x8   : > { %244 = sbr.rel (%p241_p2) target bundleno = 940 (0x3ac), region = 48  ;;  %v438_v2 = vld [vmem:[%s1620_s3] sm:$0xff] (!%p241_p2)  ;;  %1037 = vmatprep.subr.mxu0 (!%p241_p2), %v284_v1  ;;  %p273_p3 = scmp.lt.s32.totalorder (!%p241_p2), %s921_s6, 15  ;;  %v441_v6 = vld [vmem:[%s1620_s3 + $0x18] sm:$0xff] (!%p241_p2)  ;;  %v443_v9 = vld [vmem:[%s1620_s3 + $0x28] sm:$0xff] (!%p241_p2) }
   0x9   : > { %v1183_v4 = vpack.c.bf16 (!%p241_p2), %v439_v3, %v438_v2  ;;  %1038 = vmatpush3.msra.mxu0 (!%p241_p2), %v284_v1  ;;  %v1187_v7 = vpack.c.bf16 (!%p241_p2), %v441_v6, %v440_v5  ;;  %v442_v8 = vld [vmem:[%s1620_s3 + $0x20] sm:$0xff] (!%p241_p2)  ;;  %v444_v11 = vld [vmem:[%s1620_s3 + $0x30] sm:$0xff] (!%p241_p2)  ;;  %v445_v12 = vld [vmem:[%s1620_s3 + $0x38] sm:$0xff] (!%p241_p2) }
   0xa   : > { %v1191_v10 = vpack.c.bf16 (!%p241_p2), %v443_v9, %v442_v8  ;;  %v1195_v16 = vpack.c.bf16 (!%p241_p2), %v445_v12, %v444_v11  ;;  %v446_v22 = vld [vmem:[%s1620_s3 + $0x40] sm:$0xff] (!%p241_p2)  ;;  %v447_v23 = vld [vmem:[%s1620_s3 + $0x48] sm:$0xff] (!%p241_p2)  ;;  %v448_v25 = vld [vmem:[%s1620_s3 + $0x50] sm:$0xff] (!%p241_p2) }
   0xb   : > { %1184 = vmatprep.subr.bf16.mxu1 (!%p241_p2), %v1183_v4  ;;  %v1199_v24 = vpack.c.bf16 (!%p241_p2), %v447_v23, %v446_v22  ;;  %v449_v26 = vld [vmem:[%s1620_s3 + $0x58] sm:$0xff] (!%p241_p2)  ;;  %v450_v28 = vld [vmem:[%s1620_s3 + $0x60] sm:$0xff] (!%p241_p2)  ;;  %v451_v29 = vld [vmem:[%s1620_s3 + $0x68] sm:$0xff] (!%p241_p2) }
   0xc   : > { %1186 = vmatpush3.bf16.msra.mxu1 (!%p241_p2), %v1183_v4  ;;  %v1203_v27 = vpack.c.bf16 (!%p241_p2), %v449_v26, %v448_v25  ;;  %v1207_v30 = vpack.c.bf16 (!%p241_p2), %v451_v29, %v450_v28  ;;  %v452_v31 = vld [vmem:[%s1620_s3 + $0x70] sm:$0xff] (!%p241_p2)  ;;  %v453_v32 = vld [vmem:[%s1620_s3 + $0x78] sm:$0xff] (!%p241_p2)  ;;  %v935_v34 = vld [vmem:[%s1620_s3 + $0x80] sm:$0xff] (!%p241_p2) }
   0xd   : > { %1188 = vmatprep.subr.bf16.mxu1 (!%p241_p2), %v1187_v7  ;;  %v1211_v33 = vpack.c.bf16 (!%p241_p2), %v453_v32, %v452_v31  ;;  %v936_v35 = vld [vmem:[%s1620_s3 + $0x88] sm:$0xff] (!%p241_p2)  ;;  %v937_v36 = vld [vmem:[%s1620_s3 + $0x90] sm:$0xff] (!%p241_p2)  ;;  %v938_v38 = vld [vmem:[%s1620_s3 + $0x98] sm:$0xff] (!%p241_p2) }
   0xe   : > { %v1215_v37 = vpack.c.bf16 (!%p241_p2), %v936_v35, %v935_v34  ;;  %v1219_v39 = vpack.c.bf16 (!%p241_p2), %v938_v38, %v937_v36  ;;  %v939_v40 = vld [vmem:[%s1620_s3 + $0xa0] sm:$0xff] (!%p241_p2)  ;;  %v940_v41 = vld [vmem:[%s1620_s3 + $0xa8] sm:$0xff] (!%p241_p2)  ;;  %v941_v43 = vld [vmem:[%s1620_s3 + $0xb0] sm:$0xff] (!%p241_p2) }
   0xf   : > { %s1626_s6 = smov (!%p273_p3, %s921_s6), 15  ;;  %v1223_v42 = vpack.c.bf16 %v940_v41, %v939_v40  ;;  %v942_v44 = vld [vmem:[%s1620_s3 + $0xb8] sm:$0xff]  ;;  %v925_v46 = vld [vmem:[%s1619_s2] ss:$0 sm:$0xff]  ;;  %v944_v8 = vld [vmem:[%s1620_s3 + $0xc8] sm:$0xff] }
  0x10   : > { %s922_s19 = sshll.u32 %s1626_s6, 3  ;;  %1190 = vmatpush3.bf16.msra.mxu1 %v1187_v7  ;;  %1216 = vmatprep.subr.bf16.mxu0 %v1215_v37  ;;  %v1227_v45 = vpack.c.bf16 %v942_v44, %v941_v43  ;;  %v943_v7 = vld [vmem:[%s1620_s3 + $0xc0] sm:$0xff]  ;;  %v946_v11 = vld [vmem:[%s1620_s3 + $0xd8] sm:$0xff]  ;;  %v717_v26 = vld [vmem:[%s1622_s5 + $0x28] sm:$0xff] }
  0x11   : > { %s276_s22 = scalar_lea.vmem %s1617_s0, %s922_s19  ;;  %1192 = vmatprep.subr.bf16.mxu1 %v1191_v10  ;;  %v1231_v9 = vpack.c.bf16 %v944_v8, %v943_v7  ;;  %v715_v23 = vld [vmem:[%s1622_s5 + $0x18] sm:$0xff]  ;;  %v716_v25 = vld [vmem:[%s1622_s5 + $0x20] sm:$0xff]  ;;  %v718_v28 = vld [vmem:[%s1622_s5 + $0x30] sm:$0xff]  ;;  %s282_s9 = scalar_lea.vmem %s1624_s7, %s922_s19 }
  0x12   : > { %v285_v13 = vld [vmem:[%s276_s22] sm:$0xff]  ;;  %v286_v14 = vld [vmem:[%s276_s22 + $0x8] sm:$0xff]  ;;  %v287_v15 = vld [vmem:[%s276_s22 + $0x10] sm:$0xff] }
  0x13   : > { %1039 = vmatprep.mubr.msk.f32.mxu0 %vm300_vm0, %v285_v13  ;;  %v288_v17 = vld [vmem:[%s276_s22 + $0x18] sm:$0xff]  ;;  %v289_v18 = vld [vmem:[%s276_s22 + $0x20] sm:$0xff]  ;;  %v290_v19 = vld [vmem:[%s276_s22 + $0x28] sm:$0xff] }
  0x14   : > { %1040 = vmatmul.mubr.msk.f32.vlgmr.msra.gmra.mrb[0].mxu0 %vm300_vm0, %v286_v14  ;;  %1194 = vmatpush3.bf16.msra.mxu1 %v1191_v10  ;;  %v291_v20 = vld [vmem:[%s276_s22 + $0x30] sm:$0xff]  ;;  %v292_v21 = vld [vmem:[%s276_s22 + $0x38] sm:$0xff]  ;;  %v947_v13 = vld [vmem:[%s1620_s3 + $0xe0] sm:$0xff] }
  0x15   : > { %1042 = vmatprep.mubr.msk.f32.mxu0 %vm300_vm0, %v287_v15  ;;  %1196 = vmatprep.subr.bf16.mxu1 %v1195_v16  ;;  %v945_v10 = vld [vmem:[%s1620_s3 + $0xd0] sm:$0xff]  ;;  %v948_v14 = vld [vmem:[%s1620_s3 + $0xe8] sm:$0xff]  ;;  %v719_v29 = vld [vmem:[%s1622_s5 + $0x38] sm:$0xff] }
  0x16   : > { %1218 = vmatpush3.bf16.msra.mxu0 %v1215_v37  ;;  %v1235_v12 = vpack.c.bf16 %v946_v11, %v945_v10  ;;  %v1239_v15 = vpack.c.bf16 %v948_v14, %v947_v13  ;;  %v934_v31 = vld [vmem:[%s1621_s4] ss:$0 sm:$0xff] }
  0x17   : > { %1220 = vmatprep.subr.bf16.mxu0 %v1219_v39 }
  0x18   : > { %1043 = vmatmul.mubr.msk.f32.gmra.mrb[2].mxu0 %vm300_vm0, %v288_v17  ;;  %1198 = vmatpush3.bf16.msra.mxu1 %v1195_v16  ;;  %v949_v16 = vld [vmem:[%s1620_s3 + $0xf0] sm:$0xff]  ;;  %v950_v17 = vld [vmem:[%s1620_s3 + $0xf8] sm:$0xff] }
  0x19   : > { %1045 = vmatprep.mubr.msk.f32.mxu0 %vm300_vm0, %v289_v18  ;;  %1200 = vmatprep.subr.bf16.mxu1 %v1199_v24  ;;  %v1243_v18 = vpack.c.bf16 %v950_v17, %v949_v16 }
  0x1a   : > { %1222 = vmatpush3.bf16.msra.mxu0 %v1219_v39 }
  0x1b   : > { %1224 = vmatprep.subr.bf16.mxu0 %v1223_v42 }
  0x1c   : > { %1046 = vmatmul.mubr.msk.f32.gmra.mrb[4].mxu0 %vm300_vm0, %v290_v19  ;;  %1202 = vmatpush3.bf16.msra.mxu1 %v1199_v24  ;;  %v712_v19 = vld [vmem:[%s1622_s5] sm:$0xff] }
  0x1d   : > { %1048 = vmatprep.mubr.msk.f32.mxu0 %vm300_vm0, %v291_v20  ;;  %1204 = vmatprep.subr.bf16.mxu1 %v1203_v27  ;;  %v713_v20 = vld [vmem:[%s1622_s5 + $0x8] sm:$0xff] }
  0x1e   : > { %1226 = vmatpush3.bf16.msra.mxu0 %v1223_v42  ;;  %v1247_v22 = vpack.c.bf16 %v713_v20, %v712_v19 }
  0x1f   : > { %1228 = vmatprep.subr.bf16.mxu0 %v1227_v45 }
  0x20   : > { %1049 = vmatmul.mubr.msk.f32.gmra.mrb[6].mxu0 %vm300_vm0, %v292_v21  ;;  %1206 = vmatpush3.bf16.msra.mxu1 %v1203_v27  ;;  %v714_v21 = vld [vmem:[%s1622_s5 + $0x10] sm:$0xff]  ;;  %v1255_v27 = vpack.c.bf16 %v717_v26, %v716_v25 }
  0x21   : > { %1208 = vmatprep.subr.bf16.mxu1 %v1207_v30  ;;  %v1251_v24 = vpack.c.bf16 %v715_v23, %v714_v21 }
  0x22   : > { %1230 = vmatpush3.bf16.msra.mxu0 %v1227_v45 }
  0x23   : > { %1232 = vmatprep.subr.bf16.mxu0 %v1231_v9 }
  0x24   : > { %1210 = vmatpush3.bf16.msra.mxu1 %v1207_v30  ;;  %v1259_v30 = vpack.c.bf16 %v719_v29, %v718_v28 }
  0x25   : > { %1212 = vmatprep.subr.bf16.mxu1 %v1211_v33 }
  0x26   : > { %1234 = vmatpush3.bf16.msra.mxu0 %v1231_v9 }
  0x27   : > { %1236 = vmatprep.subr.bf16.mxu0 %v1235_v12 }
  0x28   : > { %1214 = vmatpush3.bf16.msra.mxu1 %v1211_v33 }
  0x29   : > { %1279 = vmatprep.subr.bf16.mxu1 %v1247_v22 }
  0x2a   : > { %1238 = vmatpush3.bf16.msra.mxu0 %v1235_v12 }
  0x2b   : > { %1240 = vmatprep.subr.bf16.mxu0 %v1239_v15 }
  0x2e   : > { %1242 = vmatpush3.bf16.msra.mxu0 %v1239_v15 }
  0x2f   : > { %1244 = vmatprep.subr.bf16.mxu0 %v1243_v18 }
  0x32   : > { %1246 = vmatpush3.bf16.msra.mxu0 %v1243_v18 }
  0x33   : > { %1248 = vmatprep.subr.bf16.mxu0 %v1247_v22 }
  0xe7   : > { %v1041_v47 = vpop.f32.mrb[0].mxu0 }
  0xe8   : > { %v397_v48 = vadd.f32 %v1041_v47, %v925_v46  ;;  %v391_v49 = vpop.f32.mrb[1].mxu0 }
  0xe9   : > { %v392_v50 = vadd.f32 %v925_v46, %v391_v49 }
  0xeb   : > { %1305 = vtanh.f32 %v392_v50  ;;  %v1044_v51 = vpop.f32.mrb[2].mxu0 }
  0xec   : > { %1307 = vtanh.f32 %v397_v48  ;;  %v407_v52 = vadd.f32 %v1044_v51, %v925_v46  ;;  %v401_v53 = vpop.f32.mrb[3].mxu0 }
  0xed   : > { %v402_v54 = vadd.f32 %v925_v46, %v401_v53 }
  0xef   : > { %1309 = vtanh.f32 %v402_v54  ;;  %v1047_v55 = vpop.f32.mrb[4].mxu0 }
  0xf0   : > { %1311 = vtanh.f32 %v407_v52  ;;  %v417_v56 = vadd.f32 %v1047_v55, %v925_v46  ;;  %v411_v57 = vpop.f32.mrb[5].mxu0 }
  0xf1   : > { %v412_v58 = vadd.f32 %v925_v46, %v411_v57  ;;  %v721_v57 = vld [vmem:[%s1622_s5 + $0x48] sm:$0xff] }
  0xf3   : > { %1313 = vtanh.f32 %v412_v58  ;;  %v1050_v59 = vpop.f32.mrb[6].mxu0 }
  0xf4   : > { %1315 = vtanh.f32 %v417_v56  ;;  %v427_v60 = vadd.f32 %v1050_v59, %v925_v46  ;;  %v421_v61 = vpop.f32.mrb[7].mxu0  ;;  %v720_v56 = vld [vmem:[%s1622_s5 + $0x40] sm:$0xff]  ;;  %v722_v59 = vld [vmem:[%s1622_s5 + $0x50] sm:$0xff] }
  0xf5   : > { %v1306_v62 = vpop.eup %1305  ;;  %v422_v63 = vadd.f32 %v925_v46, %v421_v61  ;;  %v1263_v58 = vpack.c.bf16 %v721_v57, %v720_v56 }
  0xf6   : > { %v1308_v0 = vpop.eup %1307  ;;  %1083 = vmatprep.mubr.f32.mxu1 %v1306_v62  ;;  %v724_v62 = vld [vmem:[%s1622_s5 + $0x60] sm:$0xff] }
  0xf7   : > { %1317 = vtanh.f32 %v422_v63  ;;  %1084 = vmatmul.mubr.f32.vlgmr.msra.gmra.mrb[0].mxu1 %v1308_v0  ;;  %v725_v63 = vld [vmem:[%s1622_s5 + $0x68] sm:$0xff] }
  0xf8   : > { %1319 = vtanh.f32 %v427_v60  ;;  %1287 = vmatpush3.bf16.msra.mxu1 %v1247_v22  ;;  %v723_v60 = vld [vmem:[%s1622_s5 + $0x58] sm:$0xff]  ;;  %v1271_v0 = vpack.c.bf16 %v725_v63, %v724_v62 }
  0xf9   : > { %v1310_v1 = vpop.eup %1309  ;;  %1280 = vmatprep.subr.bf16.mxu1 %v1251_v24  ;;  %v1267_v61 = vpack.c.bf16 %v723_v60, %v722_v59 }
  0xfa   : > { %v1312_v2 = vpop.eup %1311  ;;  %1086 = vmatprep.mubr.f32.mxu1 %v1310_v1  ;;  %v726_v1 = vld [vmem:[%s1622_s5 + $0x70] sm:$0xff] }
  0xfb   : > { %1087 = vmatmul.mubr.f32.gmra.mrb[2].mxu1 %v1312_v2  ;;  %v727_v2 = vld [vmem:[%s1622_s5 + $0x78] sm:$0xff] }
  0xfc   : > { %1288 = vmatpush3.bf16.msra.mxu1 %v1251_v24 }
  0xfd   : > { %v1314_v3 = vpop.eup %1313  ;;  %1281 = vmatprep.subr.bf16.mxu1 %v1255_v27 }
  0xfe   : > { %v1316_v4 = vpop.eup %1315  ;;  %1089 = vmatprep.mubr.f32.mxu1 %v1314_v3  ;;  %v1275_v3 = vpack.c.bf16 %v727_v2, %v726_v1 }
  0xff   : > { %1090 = vmatmul.mubr.f32.gmra.mrb[4].mxu1 %v1316_v4  ;;  %v953_v4 = vld [vmem:[#allocation2] ss:$0 sm:$0xff] }
 0x100   : > { %1289 = vmatpush3.bf16.msra.mxu1 %v1255_v27 }
 0x101   : > { %v1318_v5 = vpop.eup %1317  ;;  %1282 = vmatprep.subr.bf16.mxu1 %v1259_v30 }
 0x102   : > { %v1320_v6 = vpop.eup %1319  ;;  %1092 = vmatprep.mubr.f32.mxu1 %v1318_v5  ;;  %v1377_v5 = vmov 0  }
 0x103   : > { %1093 = vmatmul.mubr.f32.gmra.mrb[6].mxu1 %v1320_v6  ;;  %1304 = vset.pattern.permute.xlu0 %v1377_v5  ;;  %v952_v6 = vld [vmem:[%s1621_s4 + $0x1] ss:$0 sm:$0xff] }
 0x104   : > { %1290 = vmatpush3.bf16.msra.mxu1 %v1259_v30  ;;  %735 = vperm.xlu0 %1304, %v953_v4  }
 0x105   : > { %1283 = vmatprep.subr.bf16.mxu1 %v1263_v58 }
 0x108   : > { %1291 = vmatpush3.bf16.msra.mxu1 %v1263_v58 }
 0x109   : > { %1284 = vmatprep.subr.bf16.mxu1 %v1267_v61 }
 0x10c   : > { %1292 = vmatpush3.bf16.msra.mxu1 %v1267_v61 }
 0x10d   : > { %1285 = vmatprep.subr.bf16.mxu1 %v1271_v0 }
 0x110   : > { %1293 = vmatpush3.bf16.msra.mxu1 %v1271_v0 }
 0x111   : > { %1286 = vmatprep.subr.bf16.mxu1 %v1275_v3 }
 0x114   : > { %1294 = vmatpush3.bf16.msra.mxu1 %v1275_v3 }
 0x1ca   : > { %v1085_v32 = vpop.f32.mrb[0].mxu1 }
 0x1cb   : > { %v533_v33 = vadd.f32 %v1085_v32, %v934_v31  ;;  %v527_v34 = vpop.f32.mrb[1].mxu1 }
 0x1cc   : > { %v528_v35 = vadd.f32 %v934_v31, %v527_v34 }
 0x1ce   : > { %1321 = vtanh.f32 %v528_v35  ;;  %v1088_v36 = vpop.f32.mrb[2].mxu1 }
 0x1cf   : > { %1323 = vtanh.f32 %v533_v33  ;;  %v543_v37 = vadd.f32 %v1088_v36, %v934_v31  ;;  %v537_v38 = vpop.f32.mrb[3].mxu1 }
 0x1d0   : > { %v538_v39 = vadd.f32 %v934_v31, %v537_v38 }
 0x1d2   : > { %1325 = vtanh.f32 %v538_v39  ;;  %v1091_v40 = vpop.f32.mrb[4].mxu1 }
 0x1d3   : > { %1327 = vtanh.f32 %v543_v37  ;;  %v553_v41 = vadd.f32 %v1091_v40, %v934_v31  ;;  %v547_v42 = vpop.f32.mrb[5].mxu1 }
 0x1d4   : > { %v548_v43 = vadd.f32 %v934_v31, %v547_v42 }
 0x1d6   : > { %1329 = vtanh.f32 %v548_v43  ;;  %v1094_v44 = vpop.f32.mrb[6].mxu1 }
 0x1d7   : > { %1331 = vtanh.f32 %v553_v41  ;;  %v563_v45 = vadd.f32 %v1094_v44, %v934_v31  ;;  %v557_v46 = vpop.f32.mrb[7].mxu1 }
 0x1d8   : > { %v1322_v47 = vpop.eup %1321  ;;  %v558_v48 = vadd.f32 %v934_v31, %v557_v46  ;;  %v736_v31 = vpop.permute.xlu0 %735 }
 0x1d9   : > { %v1324_v49 = vpop.eup %1323  ;;  %1127 = vmatprep.mubr.f32.mxu0 %v1322_v47 }
 0x1da   : > { %1333 = vtanh.f32 %v558_v48  ;;  %1128 = vmatmul.mubr.f32.vlgmr.msra.gmra.mrb[8].mxu0 %v1324_v49 }
 0x1db   : > { %1335 = vtanh.f32 %v563_v45  ;;  %1250 = vmatpush3.bf16.msra.mxu0 %v1247_v22 }
 0x1dc   : > { %v1326_v50 = vpop.eup %1325  ;;  %1252 = vmatprep.subr.bf16.mxu0 %v1251_v24 }
 0x1dd   : > { %v1328_v51 = vpop.eup %1327  ;;  %1130 = vmatprep.mubr.f32.mxu0 %v1326_v50 }
 0x1de   : > { %1131 = vmatmul.mubr.f32.gmra.mrb[10].mxu0 %v1328_v51 }
 0x1df   : > { %1254 = vmatpush3.bf16.msra.mxu0 %v1251_v24 }
 0x1e0   : > { %v1330_v52 = vpop.eup %1329  ;;  %1256 = vmatprep.subr.bf16.mxu0 %v1255_v27 }
 0x1e1   : > { %v1332_v53 = vpop.eup %1331  ;;  %1133 = vmatprep.mubr.f32.mxu0 %v1330_v52 }
 0x1e2   : > { %1134 = vmatmul.mubr.f32.gmra.mrb[12].mxu0 %v1332_v53 }
 0x1e3   : > { %1258 = vmatpush3.bf16.msra.mxu0 %v1255_v27 }
 0x1e4   : > { %v1334_v54 = vpop.eup %1333  ;;  %1260 = vmatprep.subr.bf16.mxu0 %v1259_v30 }
 0x1e5   : > { %v1336_v55 = vpop.eup %1335  ;;  %1136 = vmatprep.mubr.f32.mxu0 %v1334_v54 }
 0x1e6   : > { %1137 = vmatmul.mubr.f32.gmra.mrb[14].mxu0 %v1336_v55 }
 0x1e7   : > { %1262 = vmatpush3.bf16.msra.mxu0 %v1259_v30 }
 0x1e8   : > { %1264 = vmatprep.subr.bf16.mxu0 %v1263_v58 }
 0x1eb   : > { %1266 = vmatpush3.bf16.msra.mxu0 %v1263_v58 }
 0x1ec   : > { %1268 = vmatprep.subr.bf16.mxu0 %v1267_v61 }
 0x1ef   : > { %1270 = vmatpush3.bf16.msra.mxu0 %v1267_v61 }
 0x1f0   : > { %1272 = vmatprep.subr.bf16.mxu0 %v1271_v0 }
 0x1f3   : > { %1274 = vmatpush3.bf16.msra.mxu0 %v1271_v0 }
 0x1f4   : > { %1276 = vmatprep.subr.bf16.mxu0 %v1275_v3 }
 0x1f7   : > { %1278 = vmatpush3.bf16.msra.mxu0 %v1275_v3 }
 0x2ad   : > { %v1129_v7 = vpop.f32.mrb[8].mxu0 }
 0x2ae   : > { %v671_v8 = vadd.f32 %v1129_v7, %v952_v6  ;;  %v665_v9 = vpop.f32.mrb[9].mxu0 }
 0x2af   : > { %v666_v10 = vadd.f32 %v952_v6, %v665_v9 }
 0x2b1   : > { %1337 = vtanh.f32 %v666_v10  ;;  %v1132_v11 = vpop.f32.mrb[10].mxu0 }
 0x2b2   : > { %1339 = vtanh.f32 %v671_v8  ;;  %v681_v12 = vadd.f32 %v1132_v11, %v952_v6  ;;  %v675_v13 = vpop.f32.mrb[11].mxu0 }
 0x2b3   : > { %v676_v14 = vadd.f32 %v952_v6, %v675_v13 }
 0x2b5   : > { %1341 = vtanh.f32 %v676_v14  ;;  %v1135_v15 = vpop.f32.mrb[12].mxu0 }
 0x2b6   : > { %1343 = vtanh.f32 %v681_v12  ;;  %v691_v16 = vadd.f32 %v1135_v15, %v952_v6  ;;  %v685_v17 = vpop.f32.mrb[13].mxu0 }
 0x2b7   : > { %v686_v18 = vadd.f32 %v952_v6, %v685_v17 }
 0x2b9   : > { %1345 = vtanh.f32 %v686_v18  ;;  %v1138_v19 = vpop.f32.mrb[14].mxu0 }
 0x2ba   : > { %1347 = vtanh.f32 %v691_v16  ;;  %v701_v20 = vadd.f32 %v1138_v19, %v952_v6  ;;  %v695_v21 = vpop.f32.mrb[15].mxu0 }
 0x2bb   : > { %v1338_v22 = vpop.eup %1337  ;;  %v696_v23 = vadd.f32 %v952_v6, %v695_v21 }
 0x2bc   : > { %v1340_v24 = vpop.eup %1339  ;;  %1171 = vmatprep.mubr.f32.mxu0 %v1338_v22 }
 0x2bd   : > { %1349 = vtanh.f32 %v696_v23  ;;  %1172 = vmatmul.mubr.f32.vlgmr.msra.gmra.mrb[16].mxu0 %v1340_v24 }
 0x2be   : > { %1351 = vtanh.f32 %v701_v20 }
 0x2bf   : > { %v1342_v25 = vpop.eup %1341 }
 0x2c0   : > { %v1344_v26 = vpop.eup %1343  ;;  %1174 = vmatprep.mubr.f32.mxu1 %v1342_v25 }
 0x2c1   : > { %1175 = vmatmul.mubr.f32.vlgmr.msra.gmra.mrb[8].mxu1 %v1344_v26 }
 0x2c3   : > { %v1346_v27 = vpop.eup %1345 }
 0x2c4   : > { %v1348_v28 = vpop.eup %1347  ;;  %1177 = vmatprep.mubr.f32.mxu1 %v1346_v27 }
 0x2c5   : > { %1178 = vmatmul.mubr.f32.gmra.mrb[10].mxu1 %v1348_v28 }
 0x2c7   : > { %v1350_v29 = vpop.eup %1349 }
 0x2c8   : > { %v1352_v30 = vpop.eup %1351  ;;  %1180 = vmatprep.mubr.f32.mxu1 %v1350_v29 }
 0x2c9   : > { %1181 = vmatmul.mubr.f32.gmra.mrb[12].mxu1 %v1352_v30 }
 0x390   : > { %v1173_v32 = vpop.f32.mrb[16].mxu0 }
 0x391   : > { %v810_v33 = vadd.f32 %v1173_v32, %v736_v31  ;;  %v804_v34 = vpop.f32.mrb[17].mxu0 }
 0x392   : > { %v805_v35 = vadd.f32 %v804_v34, %v736_v31 }
 0x393   : > { %1353 = vtanh.f32 %v810_v33 }
 0x394   : > { %1355 = vtanh.f32 %v805_v35  ;;  %v1176_v36 = vpop.f32.mrb[8].mxu1 }
 0x395   : > { %v820_v37 = vadd.f32 %v1176_v36, %v736_v31  ;;  %v814_v38 = vpop.f32.mrb[9].mxu1 }
 0x396   : > { %v815_v39 = vadd.f32 %v814_v38, %v736_v31 }
 0x397   : > { %1357 = vtanh.f32 %v820_v37 }
 0x398   : > { %1359 = vtanh.f32 %v815_v39  ;;  %v1179_v40 = vpop.f32.mrb[10].mxu1 }
 0x399   : > { %v830_v41 = vadd.f32 %v1179_v40, %v736_v31  ;;  %v824_v42 = vpop.f32.mrb[11].mxu1 }
 0x39a   : > { %v825_v43 = vadd.f32 %v824_v42, %v736_v31 }
 0x39b   : > { %1361 = vtanh.f32 %v830_v41 }
 0x39c   : > { %1363 = vtanh.f32 %v825_v43  ;;  %v1182_v44 = vpop.f32.mrb[12].mxu1 }
 0x39d   : > { %v1354_v45 = vpop.eup %1353  ;;  %v840_v46 = vadd.f32 %v1182_v44, %v736_v31  ;;  %v834_v47 = vpop.f32.mrb[13].mxu1 }
 0x39e   : > { %v1356_v48 = vpop.eup %1355  ;;  %853 = vst.msk [vmem:[%s282_s9 + $0x8] sm:$0xff] %vm851_vm1, %v1354_v45  ;;  %v835_v49 = vadd.f32 %v834_v47, %v736_v31 }
 0x39f   : > { %852 = vst.msk [vmem:[%s282_s9] sm:$0xff] %vm851_vm1, %v1356_v48  ;;  %1365 = vtanh.f32 %v840_v46 }
 0x3a0   : > { %1367 = vtanh.f32 %v835_v49 }
 0x3a1   : > { %v1358_v50 = vpop.eup %1357 }
 0x3a2   : > { %v1360_v51 = vpop.eup %1359  ;;  %855 = vst.msk [vmem:[%s282_s9 + $0x18] sm:$0xff] %vm851_vm1, %v1358_v50 }
 0x3a3   : > { %854 = vst.msk [vmem:[%s282_s9 + $0x10] sm:$0xff] %vm851_vm1, %v1360_v51 }
 0x3a5   : > { %v1362_v52 = vpop.eup %1361 }
 0x3a6   : > { %v1364_v53 = vpop.eup %1363  ;;  %857 = vst.msk [vmem:[%s282_s9 + $0x28] sm:$0xff] %vm851_vm1, %v1362_v52 }
 0x3a7   : > { %856 = vst.msk [vmem:[%s282_s9 + $0x20] sm:$0xff] %vm851_vm1, %v1364_v53 }
 0x3a9   : > { %v1366_v54 = vpop.eup %1365 }
 0x3aa   : > { %v1368_v55 = vpop.eup %1367  ;;  %859 = vst.msk [vmem:[%s282_s9 + $0x38] sm:$0xff] %vm851_vm1, %v1366_v54 }
 0x3ab   : > { %858 = vst.msk [vmem:[%s282_s9 + $0x30] sm:$0xff] %vm851_vm1, %v1368_v55 }
 0x3ac PF: > { %s19_s26 = sadd.s32 1, %s1375_s26  }
 0x3ad   : > { %p16_p4 = scmp.ge.s32.totalorder %s19_s26, 4  }
 0x3af   :  { %18 = sbr.rel (!%p16_p4) target bundleno = 3 (0x3), region = 80 }

</bundles_post_ra>
